<compile_context>
chip_gen: v6e
topology: v6e:2x2x1
jax: 0.10.0
libtpu: 0.0.40
codegen_flags: <defaults>
</compile_context>

<pallas_src>
import functools

import jax
import jax.numpy as jnp
from jax.experimental import pallas as pl
from jax.experimental.pallas import tpu as pltpu

_ELU_ALPHA = 0.05


def _elu(z, alpha):
    # ELU in f32; clamp the exp argument so the unselected branch never
    # produces inf.
    return jnp.where(z > 0.0, z, alpha * (jnp.exp(jnp.minimum(z, 0.0)) - 1.0))


def _disc_kernel(xt_ref,
                 w1_ref, b1_ref,
                 w2_ref, b2_ref,
                 w3_ref, b3_ref,
                 w4_ref, b4_ref,
                 o_ref, *, alpha):
    # xt_ref: (data_dim, tile) bf16 -- batch on the lane axis (lane-dense).
    h = xt_ref[...]

    # l1: (hidden, data_dim) @ (data_dim, tile) -> (hidden, tile), ELU
    z1 = jnp.dot(w1_ref[...], h, preferred_element_type=jnp.float32) + b1_ref[...]
    h1 = _elu(z1, alpha).astype(jnp.bfloat16)

    # l2: (hidden, hidden) @ (hidden, tile) -> (hidden, tile), ELU
    z2 = jnp.dot(w2_ref[...], h1, preferred_element_type=jnp.float32) + b2_ref[...]
    h2 = _elu(z2, alpha).astype(jnp.bfloat16)

    # l3: (hidden//2, hidden) @ (hidden, tile) -> (hidden//2, tile), ELU
    z3 = jnp.dot(w3_ref[...], h2, preferred_element_type=jnp.float32) + b3_ref[...]
    h3 = _elu(z3, alpha)                                   # keep f32 for l4

    # l4 (single output unit): elementwise scale + sublane reduce -> (1, tile).
    # Keeps the store lane-dense and avoids an M=1 matmul.
    z4 = jnp.sum(h3 * w4_ref[...], axis=0, keepdims=True) + b4_ref[...]
    o_ref[...] = jax.nn.sigmoid(z4).astype(o_ref.dtype)


def _round_up(x, m):
    return ((x + m - 1) // m) * m


def discriminator_25g_forward(x, params, *, batch_tile=512, alpha=_ELU_ALPHA):
    """Fused Discriminator25G forward.

    x: (B, data_dim) float array.
    params (PyTorch orientation): w1 (H, D), b1 (H,), w2 (H, H), b2 (H,),
      w3 (H//2, H), b3 (H//2,), w4 (1, H//2), b4 (1,).
    Returns (B, 1) float32 probabilities.
    """
    B, data_dim = x.shape

    # --- tiling -------------------------------------------------------------
    if B > batch_tile:
        tile = max(128, _round_up(batch_tile, 128))   # lane-aligned batch tile
        b_pad = _round_up(B, tile)
    else:
        tile = b_pad = B      # single full-array block (shape == array dims)
    grid = (b_pad // tile,)

    # --- layout plumbing (one fused XLA op; ideally callers store x^T/bf16) --
    xt = jnp.pad(x, ((0, b_pad - B), (0, 0))).T.astype(jnp.bfloat16)  # (D, b_pad)

    w1 = params["w1"].astype(jnp.bfloat16)
    w2 = params["w2"].astype(jnp.bfloat16)
    w3 = params["w3"].astype(jnp.bfloat16)
    w4 = params["w4"].reshape(-1, 1).astype(jnp.float32)      # (H//2, 1) column
    b1 = params["b1"].reshape(-1, 1).astype(jnp.float32)
    b2 = params["b2"].reshape(-1, 1).astype(jnp.float32)
    b3 = params["b3"].reshape(-1, 1).astype(jnp.float32)
    b4 = params["b4"].reshape(1, 1).astype(jnp.float32)

    def full(arr):   # whole-array block, constant index_map -> stays resident
        return pl.BlockSpec(arr.shape, lambda i: (0,) * arr.ndim)

    param_bytes = sum(int(a.size) * a.dtype.itemsize
                      for a in (w1, b1, w2, b2, w3, b3, w4, b4))
    # double-buffered x tile (bf16) + output tile (f32) + resident params + slack
    need = 2 * (tile * data_dim * 2 + tile * 4) + param_bytes + (4 << 20)
    vmem_limit = int(min(max(need, 32 * 1024 * 1024), 48 * 1024 * 1024))

    out_t = pl.pallas_call(
        functools.partial(_disc_kernel, alpha=alpha),
        out_shape=jax.ShapeDtypeStruct((1, b_pad), jnp.float32),
        grid=grid,
        in_specs=[
            pl.BlockSpec((data_dim, tile), lambda i: (0, i)),   # x^T tile
            full(w1), full(b1),
            full(w2), full(b2),
            full(w3), full(b3),
            full(w4), full(b4),
        ],
        out_specs=pl.BlockSpec((1, tile), lambda i: (0, i)),    # lane-dense row
        compiler_params=pltpu.CompilerParams(
            dimension_semantics=("parallel",),
            vmem_limit_bytes=vmem_limit,
        ),
    )(xt, w1, b1, w2, b2, w3, b3, w4, b4)

    # (1, b_pad) lane-dense slab -> (B, 1) column (matches the PyTorch module).
    return out_t[0, :B].reshape(B, 1)


def init_params(key, data_dim, hidden_size):
    """Synthetic params with PyTorch nn.Linear default init and orientation."""
    ks = jax.random.split(key, 8)

    def linear(kw, kb, fan_out, fan_in):
        bound = 1.0 / jnp.sqrt(jnp.float32(fan_in))
        w = jax.random.uniform(kw, (fan_out, fan_in), jnp.float32, -bound, bound)
        b = jax.random.uniform(kb, (fan_out,), jnp.float32, -bound, bound)
        return w, b

    w1, b1 = linear(ks[0], ks[1], hidden_size, data_dim)
    w2, b2 = linear(ks[2], ks[3], hidden_size, hidden_size)
    w3, b3 = linear(ks[4], ks[5], hidden_size // 2, hidden_size)
    w4, b4 = linear(ks[6], ks[7], 1, hidden_size // 2)
    return dict(w1=w1, b1=b1, w2=w2, b2=b2, w3=w3, b3=b3, w4=w4, b4=b4)


def reference_forward(x, p, alpha=_ELU_ALPHA):
    """Pure-JAX reference mirroring the kernel's precision scheme."""
    def elu(z):
        return jnp.where(z > 0.0, z, alpha * (jnp.exp(jnp.minimum(z, 0.0)) - 1.0))

    def lin_bf16(h, w, b):
        return (jnp.dot(h.astype(jnp.bfloat16), w.T.astype(jnp.bfloat16),
                        preferred_element_type=jnp.float32)
                + b.astype(jnp.float32))

    h1 = elu(lin_bf16(x, p["w1"], p["b1"]))
    h2 = elu(lin_bf16(h1, p["w2"], p["b2"]))
    h3 = elu(lin_bf16(h2, p["w3"], p["b3"]))
    z4 = jnp.dot(h3, p["w4"].T.astype(jnp.float32)) + p["b4"]
    return jax.nn.sigmoid(z4)


if __name__ == "__main__":
    key = jax.random.PRNGKey(0)
    k_x, k_p = jax.random.split(key)

    batch, data_dim, hidden_size = 16, 16, 32
    x = jax.random.normal(k_x, (batch, data_dim), jnp.float32)
    params = init_params(k_p, data_dim, hidden_size)

    out = discriminator_25g_forward(x, params, batch_tile=512)
    out = jax.block_until_ready(out)

    ref = reference_forward(x, params)
    assert out.shape == (batch, 1), out.shape
    err = float(jnp.max(jnp.abs(out - ref)))
    assert err < 1e-3, f"max abs err {err}"

    print("KERNEL_OK")
</pallas_src>

<mosaic_0001>
module attributes {stable_mosaic.version = 11 : i64} {
  func.func @_disc_kernel(%arg0: i32, %arg1: memref<16x16xbf16, #tpu.memory_space<vmem>>, %arg2: memref<32x16xbf16, #tpu.memory_space<vmem>>, %arg3: memref<32x1xf32, #tpu.memory_space<vmem>>, %arg4: memref<32x32xbf16, #tpu.memory_space<vmem>>, %arg5: memref<32x1xf32, #tpu.memory_space<vmem>>, %arg6: memref<16x32xbf16, #tpu.memory_space<vmem>>, %arg7: memref<16x1xf32, #tpu.memory_space<vmem>>, %arg8: memref<16x1xf32, #tpu.memory_space<vmem>>, %arg9: memref<1x1xf32, #tpu.memory_space<vmem>>, %arg10: memref<1x16xf32, #tpu.memory_space<vmem>>) attributes {dimension_semantics = [#tpu.dimension_semantics<parallel>], iteration_bounds = array<i64: 1>, scalar_prefetch = 0 : i64, scratch_operands = 0 : i64, tpu.core_type = #tpu.core_type<tc>, window_params = [{transform_indices = @transform_0, window_bounds = array<i64: 16, 16>}, {pipeline_mode = #tpu.pipeline_mode<synchronous>, transform_indices = @transform_1, window_bounds = array<i64: 32, 16>}, {pipeline_mode = #tpu.pipeline_mode<synchronous>, transform_indices = @transform_2, window_bounds = array<i64: 32, 1>}, {pipeline_mode = #tpu.pipeline_mode<synchronous>, transform_indices = @transform_3, window_bounds = array<i64: 32, 32>}, {pipeline_mode = #tpu.pipeline_mode<synchronous>, transform_indices = @transform_4, window_bounds = array<i64: 32, 1>}, {pipeline_mode = #tpu.pipeline_mode<synchronous>, transform_indices = @transform_5, window_bounds = array<i64: 16, 32>}, {pipeline_mode = #tpu.pipeline_mode<synchronous>, transform_indices = @transform_6, window_bounds = array<i64: 16, 1>}, {pipeline_mode = #tpu.pipeline_mode<synchronous>, transform_indices = @transform_7, window_bounds = array<i64: 16, 1>}, {pipeline_mode = #tpu.pipeline_mode<synchronous>, transform_indices = @transform_8, window_bounds = array<i64: 1, 1>}, {transform_indices = @transform_9, window_bounds = array<i64: 1, 16>}]} {
    %c0 = arith.constant 0 : index
    %c0_0 = arith.constant 0 : index
    %0 = vector.load %arg1[%c0, %c0_0] : memref<16x16xbf16, #tpu.memory_space<vmem>>, vector<16x16xbf16>
    %c0_1 = arith.constant 0 : index
    %c0_2 = arith.constant 0 : index
    %1 = vector.load %arg2[%c0_1, %c0_2] : memref<32x16xbf16, #tpu.memory_space<vmem>>, vector<32x16xbf16>
    %cst = arith.constant dense<0.000000e+00> : vector<32x16xf32>
    %2 = tpu.matmul %1, %0, %cst {dimension_numbers = #tpu.dot_dimension_numbers<[1], [0], [0], [1], [0, 0, 1, 1], [], []>} : vector<32x16xbf16>, vector<16x16xbf16>, vector<32x16xf32> -> vector<32x16xf32>
    %c0_3 = arith.constant 0 : index
    %c0_4 = arith.constant 0 : index
    %3 = vector.load %arg3[%c0_3, %c0_4] : memref<32x1xf32, #tpu.memory_space<vmem>>, vector<32x1xf32>
    %4 = vector.broadcast %3 : vector<32x1xf32> to vector<32x16xf32>
    %5 = arith.addf %2, %4 : vector<32x16xf32>
    %cst_5 = arith.constant 0.000000e+00 : f32
    %6 = vector.broadcast %cst_5 : f32 to vector<32x16xf32>
    %7 = arith.cmpf ogt, %5, %6 : vector<32x16xf32>
    %cst_6 = arith.constant 0.000000e+00 : f32
    %8 = vector.broadcast %cst_6 : f32 to vector<32x16xf32>
    %9 = arith.minimumf %5, %8 : vector<32x16xf32>
    %10 = math.exp %9 : vector<32x16xf32>
    %cst_7 = arith.constant 1.000000e+00 : f32
    %11 = vector.broadcast %cst_7 : f32 to vector<32x16xf32>
    %12 = arith.subf %10, %11 : vector<32x16xf32>
    %cst_8 = arith.constant 5.000000e-02 : f32
    %13 = vector.broadcast %cst_8 : f32 to vector<32x16xf32>
    %14 = arith.mulf %13, %12 : vector<32x16xf32>
    %15 = arith.select %7, %5, %14 : vector<32x16xi1>, vector<32x16xf32>
    %16 = arith.truncf %15 : vector<32x16xf32> to vector<32x16xbf16>
    %c0_9 = arith.constant 0 : index
    %c0_10 = arith.constant 0 : index
    %17 = vector.load %arg4[%c0_9, %c0_10] : memref<32x32xbf16, #tpu.memory_space<vmem>>, vector<32x32xbf16>
    %cst_11 = arith.constant dense<0.000000e+00> : vector<32x16xf32>
    %18 = tpu.matmul %17, %16, %cst_11 {dimension_numbers = #tpu.dot_dimension_numbers<[1], [0], [0], [1], [0, 0, 1, 1], [], []>} : vector<32x32xbf16>, vector<32x16xbf16>, vector<32x16xf32> -> vector<32x16xf32>
    %c0_12 = arith.constant 0 : index
    %c0_13 = arith.constant 0 : index
    %19 = vector.load %arg5[%c0_12, %c0_13] : memref<32x1xf32, #tpu.memory_space<vmem>>, vector<32x1xf32>
    %20 = vector.broadcast %19 : vector<32x1xf32> to vector<32x16xf32>
    %21 = arith.addf %18, %20 : vector<32x16xf32>
    %cst_14 = arith.constant 0.000000e+00 : f32
    %22 = vector.broadcast %cst_14 : f32 to vector<32x16xf32>
    %23 = arith.cmpf ogt, %21, %22 : vector<32x16xf32>
    %cst_15 = arith.constant 0.000000e+00 : f32
    %24 = vector.broadcast %cst_15 : f32 to vector<32x16xf32>
    %25 = arith.minimumf %21, %24 : vector<32x16xf32>
    %26 = math.exp %25 : vector<32x16xf32>
    %cst_16 = arith.constant 1.000000e+00 : f32
    %27 = vector.broadcast %cst_16 : f32 to vector<32x16xf32>
    %28 = arith.subf %26, %27 : vector<32x16xf32>
    %cst_17 = arith.constant 5.000000e-02 : f32
    %29 = vector.broadcast %cst_17 : f32 to vector<32x16xf32>
    %30 = arith.mulf %29, %28 : vector<32x16xf32>
    %31 = arith.select %23, %21, %30 : vector<32x16xi1>, vector<32x16xf32>
    %32 = arith.truncf %31 : vector<32x16xf32> to vector<32x16xbf16>
    %c0_18 = arith.constant 0 : index
    %c0_19 = arith.constant 0 : index
    %33 = vector.load %arg6[%c0_18, %c0_19] : memref<16x32xbf16, #tpu.memory_space<vmem>>, vector<16x32xbf16>
    %cst_20 = arith.constant dense<0.000000e+00> : vector<16x16xf32>
    %34 = tpu.matmul %33, %32, %cst_20 {dimension_numbers = #tpu.dot_dimension_numbers<[1], [0], [0], [1], [0, 0, 1, 1], [], []>} : vector<16x32xbf16>, vector<32x16xbf16>, vector<16x16xf32> -> vector<16x16xf32>
    %c0_21 = arith.constant 0 : index
    %c0_22 = arith.constant 0 : index
    %35 = vector.load %arg7[%c0_21, %c0_22] : memref<16x1xf32, #tpu.memory_space<vmem>>, vector<16x1xf32>
    %36 = vector.broadcast %35 : vector<16x1xf32> to vector<16x16xf32>
    %37 = arith.addf %34, %36 : vector<16x16xf32>
    %cst_23 = arith.constant 0.000000e+00 : f32
    %38 = vector.broadcast %cst_23 : f32 to vector<16x16xf32>
    %39 = arith.cmpf ogt, %37, %38 : vector<16x16xf32>
    %cst_24 = arith.constant 0.000000e+00 : f32
    %40 = vector.broadcast %cst_24 : f32 to vector<16x16xf32>
    %41 = arith.minimumf %37, %40 : vector<16x16xf32>
    %42 = math.exp %41 : vector<16x16xf32>
    %cst_25 = arith.constant 1.000000e+00 : f32
    %43 = vector.broadcast %cst_25 : f32 to vector<16x16xf32>
    %44 = arith.subf %42, %43 : vector<16x16xf32>
    %cst_26 = arith.constant 5.000000e-02 : f32
    %45 = vector.broadcast %cst_26 : f32 to vector<16x16xf32>
    %46 = arith.mulf %45, %44 : vector<16x16xf32>
    %47 = arith.select %39, %37, %46 : vector<16x16xi1>, vector<16x16xf32>
    %c0_27 = arith.constant 0 : index
    %c0_28 = arith.constant 0 : index
    %48 = vector.load %arg8[%c0_27, %c0_28] : memref<16x1xf32, #tpu.memory_space<vmem>>, vector<16x1xf32>
    %49 = vector.broadcast %48 : vector<16x1xf32> to vector<16x16xf32>
    %50 = arith.mulf %47, %49 : vector<16x16xf32>
    %cst_29 = arith.constant dense<0.000000e+00> : vector<16xf32>
    %51 = vector.multi_reduction <add>, %50, %cst_29 [0] : vector<16x16xf32> to vector<16xf32>
    %52 = vector.shape_cast %51 : vector<16xf32> to vector<1x16xf32>
    %c0_30 = arith.constant 0 : index
    %c0_31 = arith.constant 0 : index
    %53 = vector.load %arg9[%c0_30, %c0_31] : memref<1x1xf32, #tpu.memory_space<vmem>>, vector<1x1xf32>
    %54 = vector.broadcast %53 : vector<1x1xf32> to vector<1x16xf32>
    %55 = arith.addf %52, %54 : vector<1x16xf32>
    %56 = arith.negf %55 : vector<1x16xf32>
    %57 = math.exp %56 : vector<1x16xf32>
    %cst_32 = arith.constant 1.000000e+00 : f32
    %58 = vector.broadcast %cst_32 : f32 to vector<1x16xf32>
    %59 = arith.addf %58, %57 : vector<1x16xf32>
    %60 = arith.divf %58, %59 : vector<1x16xf32>
    %c0_33 = arith.constant 0 : index
    %c0_34 = arith.constant 0 : index
    %61 = vector.load %arg10[%c0_33, %c0_34] : memref<1x16xf32, #tpu.memory_space<vmem>>, vector<1x16xf32>
    tpu.vector_store %arg10[%c0_33, %c0_34], %60 {strides = array<i32>} : memref<1x16xf32, #tpu.memory_space<vmem>>, vector<1x16xf32>,
    return
  }
  func.func @transform_0(%arg0: i32) -> (i32, i32) {
    %c0_i32 = arith.constant 0 : i32
    %c0_i32_0 = arith.constant 0 : i32
    return %c0_i32, %arg0 : i32, i32
  }
  func.func @transform_1(%arg0: i32) -> (i32, i32) {
    %c0_i32 = arith.constant 0 : i32
    %c0_i32_0 = arith.constant 0 : i32
    %c0_i32_1 = arith.constant 0 : i32
    return %c0_i32, %c0_i32_0 : i32, i32
  }
  func.func @transform_2(%arg0: i32) -> (i32, i32) {
    %c0_i32 = arith.constant 0 : i32
    %c0_i32_0 = arith.constant 0 : i32
    %c0_i32_1 = arith.constant 0 : i32
    return %c0_i32, %c0_i32_0 : i32, i32
  }
  func.func @transform_3(%arg0: i32) -> (i32, i32) {
    %c0_i32 = arith.constant 0 : i32
    %c0_i32_0 = arith.constant 0 : i32
    %c0_i32_1 = arith.constant 0 : i32
    return %c0_i32, %c0_i32_0 : i32, i32
  }
  func.func @transform_4(%arg0: i32) -> (i32, i32) {
    %c0_i32 = arith.constant 0 : i32
    %c0_i32_0 = arith.constant 0 : i32
    %c0_i32_1 = arith.constant 0 : i32
    return %c0_i32, %c0_i32_0 : i32, i32
  }
  func.func @transform_5(%arg0: i32) -> (i32, i32) {
    %c0_i32 = arith.constant 0 : i32
    %c0_i32_0 = arith.constant 0 : i32
    %c0_i32_1 = arith.constant 0 : i32
    return %c0_i32, %c0_i32_0 : i32, i32
  }
  func.func @transform_6(%arg0: i32) -> (i32, i32) {
    %c0_i32 = arith.constant 0 : i32
    %c0_i32_0 = arith.constant 0 : i32
    %c0_i32_1 = arith.constant 0 : i32
    return %c0_i32, %c0_i32_0 : i32, i32
  }
  func.func @transform_7(%arg0: i32) -> (i32, i32) {
    %c0_i32 = arith.constant 0 : i32
    %c0_i32_0 = arith.constant 0 : i32
    %c0_i32_1 = arith.constant 0 : i32
    return %c0_i32, %c0_i32_0 : i32, i32
  }
  func.func @transform_8(%arg0: i32) -> (i32, i32) {
    %c0_i32 = arith.constant 0 : i32
    %c0_i32_0 = arith.constant 0 : i32
    %c0_i32_1 = arith.constant 0 : i32
    return %c0_i32, %c0_i32_0 : i32, i32
  }
  func.func @transform_9(%arg0: i32) -> (i32, i32) {
    %c0_i32 = arith.constant 0 : i32
    %c0_i32_0 = arith.constant 0 : i32
    return %c0_i32, %arg0 : i32, i32
  }
}

</mosaic_0001>

<bundles_post_ra>
// kernel: tpu_custom_call.1
= control target key start
LH: loop header
LB: loop body
LE: loop exit
PB: predicated region body
PF: predicated region fallthrough
CT: control target
= control target key end

     0   :  { %s658_s0 = inlined_call_operand.vmem [shape: bf16[16,16], index: 0, kind: input, shape index: {}]   ;;  %s659_s1 = inlined_call_operand.vmem [shape: bf16[32,16], index: 1, kind: input, shape index: {}]   ;;  %s660_s2 = inlined_call_operand.vmem [shape: f32[32,1], index: 2, kind: input, shape index: {}]   ;;  %s661_s3 = inlined_call_operand.vmem [shape: bf16[32,32], index: 3, kind: input, shape index: {}]   ;;  %s662_s4 = inlined_call_operand.vmem [shape: f32[32,1], index: 4, kind: input, shape index: {}]   ;;  %s663_s5 = inlined_call_operand.vmem [shape: bf16[16,32], index: 5, kind: input, shape index: {}]   ;;  %s664_s6 = inlined_call_operand.vmem [shape: f32[16,1], index: 6, kind: input, shape index: {}]   ;;  %s665_s7 = inlined_call_operand.vmem [shape: f32[16,1], index: 7, kind: input, shape index: {}]   ;;  %s666_s8 = inlined_call_operand.<no memory space> [shape: f32[1,1], index: 8, kind: input, shape index: {}]   ;;  %s667_s9 = inlined_call_operand.hbm [shape: f32[1,16], index: 9, kind: output, shape index: {}]  }
   0x1   :  { %v14_v0 = vstv %s666_s8 }
   0x2   :  { %15 = vst [vmem:[#allocation2] sm:$0x1] %v14_v0 }
   0x3   :  { %v485_v1 = vld [vmem:[%s658_s0] sm:$0xff]   ;;  %vm82_vm0 = vcmask 130048   ;;  %v487_v3 = vld [vmem:[%s659_s1 + $0x8] sm:$0xff]   ;;  %v537_v4 = vmov 0   ;;  %v44_v5 = vld [vmem:[%s660_s2 + $0x10] sm:$0xff] }
   0x4   :  { %v486_v2 = vld [vmem:[%s659_s1] sm:$0xff]   ;;  %457 = vmatprep.subr.bf16.mxu0 %v485_v1  ;;  %483 = vset.pattern.permute.xlu0 %v537_v4  ;;  %v45_v7 = vld [vmem:[%s660_s2 + $0x18] sm:$0xff]  ;;  %v43_v8 = vld [vmem:[%s660_s2 + $0x8] sm:$0xff] }
   0x5   :  { %458 = vmatpush3.bf16.msra.mxu0 %v485_v1  ;;  %459 = vmatprep.mubr.msk.bf16.mxu0 %vm82_vm0, %v486_v2  ;;  %v42_v6 = vld [vmem:[%s660_s2] sm:$0xff]  ;;  %v174_v9 = vld [vmem:[%s662_s4 + $0x10] sm:$0xff] }
   0x6   :  { %58 = vperm.xlu0 %483, %v44_v5   ;;  %484 = vset.pattern.permute.xlu1 %v537_v4 }
   0x7   :  { %48 = vperm.xlu1 %484, %v42_v6  }
   0x8   :  { %460 = vmatmul.mubr.msk.bf16.vlgmr.msra.gmra.mxu0 %vm82_vm0, %v487_v3 }
   0xa   :  { %63 = vperm.xlu0 %483, %v45_v7  }
   0xb   :  { %53 = vperm.xlu1 %484, %v43_v8  }
   0xc   :  { %16 = vsyncpa [#allocation4], 0  ;;  %v175_v10 = vld [vmem:[%s662_s4 + $0x18] sm:$0xff]  ;;  %v172_v11 = vld [vmem:[%s662_s4] sm:$0xff]  ;;  %vm206_vm1 = vcmask 261120   ;;  %v538_v58 = vmov 0.0  }
   0xd   :  { %v173_v12 = vld [vmem:[%s662_s4 + $0x8] sm:$0xff]  ;;  %v294_v13 = vld [vmem:[%s664_s6] sm:$0xff]  ;;  %471 = vmatprep.subr.bf16.mxu0 %v538_v58  ;;  %vm539_vm6 = vmmov 0   ;;  %vm409_vm13 = vcmask 122880  }
   0xe   :  { %188 = vperm.xlu0 %483, %v174_v9   ;;  %v295_v14 = vld [vmem:[%s664_s6 + $0x8] sm:$0xff]  ;;  %v369_v15 = vld [vmem:[%s665_s7] sm:$0xff]  ;;  %475 = vmatprep.mubr.msk.bf16.mxu0 %vm539_vm6, %v538_v58 }
   0xf   :  { %193 = vperm.xlu1 %484, %v175_v10   ;;  %v370_v16 = vld [vmem:[%s665_s7 + $0x8] sm:$0xff]  ;;  %v392_v17 = vld [vmem:[#allocation2] sm:$0x1] }
  0x10   :  { %v488_v18 = vld [vmem:[%s661_s3] sm:$0xff]   ;;  %v489_v57 = vld [vmem:[%s661_s3 + $0x8] sm:$0xff]  }
  0x11   :  { %467 = vmatprep.mubr.msk.bf16.mxu1 %vm206_vm1, %v488_v18 }
  0x12   :  { %178 = vperm.xlu0 %483, %v172_v11  }
  0x13   :  { %183 = vperm.xlu1 %484, %v173_v12  }
  0x16   :  { %298 = vperm.xlu0 %483, %v294_v13  }
  0x17   :  { %303 = vperm.xlu1 %484, %v295_v14  }
  0x1a   :  { %373 = vperm.xlu0 %483, %v369_v15  }
  0x1b   :  { %378 = vperm.xlu1 %484, %v370_v16  }
  0x1e   :  { %395 = vperm.xlu0 %483, %v392_v17  }
  0x81   :  { %v59_v19 = vpop.permute.xlu0 %58 }
  0x82   :  { %v49_v20 = vpop.permute.xlu1 %48 }
  0x85   :  { %v64_v26 = vpop.permute.xlu0 %63 }
  0x86   :  { %v54_v31 = vpop.permute.xlu1 %53 }
  0x89   :  { %v189_v59 = vpop.permute.xlu0 %188 }
  0x8a   :  { %v194_v61 = vpop.permute.xlu1 %193 }
  0x8d   :  { %v179_v63 = vpop.permute.xlu0 %178 }
  0x8e   :  { %v184_v8 = vpop.permute.xlu1 %183 }
  0xc8   :  { %v461_v21 = vpop.f32.mrf.mxu0 }
  0xc9   :  { %v132_v22 = vadd.f32 %v461_v21, %v59_v19 }
  0xca   :  { %v123_v23 = vpop.f32.mrf.mxu0 }
  0xcb   :  { %v144_v24 = vmin.f32 %v132_v22, 0.0  ;;  %v124_v25 = vadd.f32 %v123_v23, %v49_v20  ;;  %vm140_vm2 = vcmp.gt.f32.partialorder %v132_v22, 0.0 }
  0xcc   :  { %v462_v27 = vpop.f32.mrf.mxu0 }
  0xcd   :  { %v150_v28 = vmul.f32 1.442695, %v144_v24  ;;  %v142_v29 = vmin.f32 %v124_v25, 0.0  ;;  %v135_v30 = vadd.f32 %v462_v27, %v64_v26  ;;  %vm138_vm4 = vcmp.gt.f32.partialorder %v124_v25, 0.0 }
  0xce   :  { %v126_v32 = vpop.f32.mrf.mxu0 }
  0xcf   :  { %491 = vpow2.f32 %v150_v28  ;;  %v146_v33 = vmul.f32 1.442695, %v142_v29  ;;  %v145_v34 = vmin.f32 %v135_v30, 0.0  ;;  %v127_v35 = vadd.f32 %v126_v32, %v54_v31 }
  0xd0   :  { %vm141_vm3 = vcmp.gt.f32.partialorder %v135_v30, 0.0 }
  0xd1   :  { %493 = vpow2.f32 %v146_v33  ;;  %v152_v36 = vmul.f32 1.442695, %v145_v34  ;;  %v143_v37 = vmin.f32 %v127_v35, 0.0  ;;  %vm139_vm5 = vcmp.gt.f32.partialorder %v127_v35, 0.0  ;;  %v490_v33 = vld [vmem:[%s663_s5] sm:$0xff]   ;;  %v299_v34 = vpop.permute.xlu0 %298  ;;  %s540_s5 = smov [#allocation3]  }
  0xd2   :  { %s417_s17 = sshll.u32 %s540_s5, 4  ;;  %s418_s17 = int_to_ptr.vmem [resolvable:$true] %s417_s17 }
  0xd3   :  { %495 = vpow2.f32 %v152_v36  ;;  %v148_v38 = vmul.f32 1.442695, %v143_v37  ;;  %s515_s0 = scalar_lea.vmem %s418_s17, 16  ;;  %s519_s18 = scalar_lea.vmem %s418_s17, 32 }
  0xd4   :  { %p516_p0 = scmp.ne.s32.totalorder %s418_s17, %s515_s0  ;;  %p520_p1 = scmp.lt.s32.totalorder %s418_s17, %s418_s17 }
  0xd5   :  { %497 = vpow2.f32 %v148_v38  ;;  %p521_p2 = scmp.lt.s32.totalorder %s519_s18, %s515_s0 }
  0xd7   :  { %p522_p3 = por %p521_p2, %p520_p1 }
  0xd9   :  { %p523_p4 = pnand %p522_p3, %p516_p0 }
  0xdc   :  { %v492_v39 = vpop.eup %491 }
  0xdd   :  { %v432_v40 = vadd.f32 -1.0, %v492_v39  ;;  %v304_v39 = vpop.permute.xlu1 %303 }
  0xde   :  { %v494_v41 = vpop.eup %493 }
  0xdf   :  { %v430_v42 = vadd.f32 -1.0, %v494_v41  ;;  %v160_v45 = vmul.f32 0.05, %v432_v40 }
  0xe0   :  { %v496_v43 = vpop.eup %495 }
  0xe1   :  { %v433_v44 = vadd.f32 -1.0, %v496_v43  ;;  %v158_v49 = vmul.f32 0.05, %v430_v42  ;;  %v164_v50 = vsel %vm140_vm2, %v132_v22, %v160_v45 }
  0xe2   :  { %v498_v46 = vpop.eup %497 }
  0xe3   :  { %v431_v47 = vadd.f32 -1.0, %v498_v46  ;;  %v161_v48 = vmul.f32 0.05, %v433_v44  ;;  %v162_v54 = vsel %vm138_vm4, %v124_v25, %v158_v49 }
  0xe5   :  { %v165_v51 = vsel %vm141_vm3, %v135_v30, %v161_v48  ;;  %v159_v52 = vmul.f32 0.05, %v431_v47 }
  0xe6   :  { %v167_v53 = vpack.c.bf16 %v165_v51, %v164_v50 }
  0xe7   :  { %v163_v55 = vsel %vm139_vm5, %v127_v35, %v159_v52  ;;  %v374_v52 = vpop.permute.xlu0 %373 }
  0xe8   :  { %463 = vmatprep.subr.bf16.mxu1 %v167_v53  ;;  %v166_v56 = vpack.c.bf16 %v163_v55, %v162_v54  ;;  %v379_v55 = vpop.permute.xlu1 %378 }
  0xe9   :  { %464 = vmatpush3.bf16.msra.mxu1 %v167_v53 }
  0xea   :  { %465 = vmatprep.subr.bf16.mxu1 %v166_v56 }
  0xed   :  { %466 = vmatpush3.bf16.msra.mxu1 %v166_v56 }
  0xf0   :  { %468 = vmatmul.mubr.msk.bf16.vlgmr.msra.gmra.mxu1 %vm206_vm1, %v489_v57 }
 0x1b0   :  { %v469_v60 = vpop.f32.mrf.mxu1 }
 0x1b1   :  { %v256_v62 = vadd.f32 %v469_v60, %v189_v59  ;;  %v398_v60 = vlaneseq }
 0x1b2   :  { %v247_v0 = vpop.f32.mrf.mxu1 }
 0x1b3   :  { %v268_v1 = vmin.f32 %v256_v62, 0.0  ;;  %v248_v2 = vadd.f32 %v247_v0, %v179_v63  ;;  %vm264_vm7 = vcmp.gt.f32.partialorder %v256_v62, 0.0  ;;  %v399_v63 = vshrl.u32 %v398_v60, 7 }
 0x1b4   :  { %v470_v3 = vpop.f32.mrf.mxu1 }
 0x1b5   :  { %v274_v4 = vmul.f32 1.442695, %v268_v1  ;;  %v266_v5 = vmin.f32 %v248_v2, 0.0  ;;  %v259_v6 = vadd.f32 %v470_v3, %v194_v61  ;;  %vm262_vm10 = vcmp.gt.f32.partialorder %v248_v2, 0.0 }
 0x1b6   :  { %v250_v7 = vpop.f32.mrf.mxu1 }
 0x1b7   :  { %499 = vpow2.f32 %v274_v4  ;;  %v270_v9 = vmul.f32 1.442695, %v266_v5  ;;  %v269_v10 = vmin.f32 %v259_v6, 0.0  ;;  %v251_v11 = vadd.f32 %v250_v7, %v184_v8  ;;  %v396_v4 = vpop.permute.xlu0 %395 }
 0x1b8   :  { %vm265_vm8 = vcmp.gt.f32.partialorder %v259_v6, 0.0 }
 0x1b9   :  { %501 = vpow2.f32 %v270_v9  ;;  %v276_v12 = vmul.f32 1.442695, %v269_v10  ;;  %v267_v13 = vmin.f32 %v251_v11, 0.0  ;;  %vm263_vm9 = vcmp.gt.f32.partialorder %v251_v11, 0.0 }
 0x1bb   :  { %503 = vpow2.f32 %v276_v12  ;;  %v272_v14 = vmul.f32 1.442695, %v267_v13 }
 0x1bd   :  { %505 = vpow2.f32 %v272_v14 }
 0x1c4   :  { %v500_v15 = vpop.eup %499 }
 0x1c5   :  { %v440_v16 = vadd.f32 -1.0, %v500_v15 }
 0x1c6   :  { %v502_v17 = vpop.eup %501 }
 0x1c7   :  { %v284_v19 = vmul.f32 0.05, %v440_v16  ;;  %v438_v20 = vadd.f32 -1.0, %v502_v17 }
 0x1c8   :  { %v504_v18 = vpop.eup %503 }
 0x1c9   :  { %v441_v21 = vadd.f32 -1.0, %v504_v18  ;;  %v288_v25 = vsel %vm264_vm7, %v256_v62, %v284_v19  ;;  %v282_v26 = vmul.f32 0.05, %v438_v20 }
 0x1ca   :  { %v506_v22 = vpop.eup %505 }
 0x1cb   :  { %v285_v23 = vmul.f32 0.05, %v441_v21  ;;  %v439_v24 = vadd.f32 -1.0, %v506_v22  ;;  %v286_v31 = vsel %vm262_vm10, %v248_v2, %v282_v26  ;;  %v400_v2 = vsub.s32 0, %v399_v63 }
 0x1cd   :  { %v289_v27 = vsel %vm265_vm8, %v259_v6, %v285_v23  ;;  %v283_v29 = vmul.f32 0.05, %v439_v24  ;;  %v401_v6 = vrot.slane %v396_v4, %v400_v2 }
 0x1ce   :  { %v291_v28 = vpack.c.bf16 %v289_v27, %v288_v25 }
 0x1cf   :  { %v287_v30 = vsel %vm263_vm9, %v251_v11, %v283_v29 }
 0x1d0   :  { %472 = vmatpush3.bf16.msra.mxu0 %v291_v28  ;;  %v290_v32 = vpack.c.bf16 %v287_v30, %v286_v31 }
 0x1d1   :  { %473 = vmatprep.subr.bf16.mxu0 %v538_v58 }
 0x1d4   :  { %474 = vmatpush3.bf16.msra.mxu0 %v290_v32 }
 0x1d7   :  { %476 = vmatmul.mubr.msk.bf16.vlgmr.msra.gmra.mxu0 %vm206_vm1, %v490_v33 }
 0x297   :  { %v348_v35 = vpop.f32.mrf.mxu0 }
 0x298   :  { %v349_v36 = vadd.f32 %v348_v35, %v299_v34 }
 0x299   :  { %v477_v37 = vpop.f32.mrf.mxu0 }
 0x29a   :  { %v357_v38 = vmin.f32 %v349_v36, 0.0  ;;  %vm355_vm11 = vcmp.gt.f32.partialorder %v349_v36, 0.0 }
 0x29b   :  { %v351_v40 = vpop.f32.mrf.mxu0 }
 0x29c   :  { %v359_v41 = vmul.f32 1.442695, %v357_v38  ;;  %v352_v42 = vadd.f32 %v351_v40, %v304_v39 }
 0x29d   :  { %v478_v43 = vpop.f32.mrf.mxu0 }
 0x29e   :  { %507 = vpow2.f32 %v359_v41  ;;  %v358_v44 = vmin.f32 %v352_v42, 0.0  ;;  %vm356_vm12 = vcmp.gt.f32.partialorder %v352_v42, 0.0 }
 0x2a0   :  { %v361_v45 = vmul.f32 1.442695, %v358_v44 }
 0x2a2   :  { %509 = vpow2.f32 %v361_v45 }
 0x2ab   :  { %v508_v46 = vpop.eup %507 }
 0x2ac   :  { %v444_v47 = vadd.f32 -1.0, %v508_v46 }
 0x2ae   :  { %v365_v48 = vmul.f32 0.05, %v444_v47 }
 0x2af   :  { %v510_v49 = vpop.eup %509 }
 0x2b0   :  { %v367_v50 = vsel %vm355_vm11, %v349_v36, %v365_v48  ;;  %v445_v51 = vadd.f32 -1.0, %v510_v49 }
 0x2b1   :  { %v381_v54 = vmul.f32 %v374_v52, %v367_v50 }
 0x2b2   :  { %v366_v53 = vmul.f32 0.05, %v445_v51 }
 0x2b3   :  { %v383_v58 = vsel %vm82_vm0, %v381_v54, 0.0 }
 0x2b4   :  { %v368_v56 = vsel %vm356_vm12, %v352_v42, %v366_v53 }
 0x2b5   :  { %v382_v57 = vmul.f32 %v379_v55, %v368_v56 }
 0x2b7   :  { %v384_v59 = vsel %vm82_vm0, %v382_v57, 0.0 }
 0x2b8   :  { %v385_v61 = vadd.f32 %v384_v59, %v383_v58 }
 0x2ba   :  { %v386_v62 = vrot.slane %v385_v61, 4 }
 0x2bc   :  { %v387_v0 = vadd.f32 %v386_v62, %v385_v61 }
 0x2be   :  { %v388_v1 = vrot.slane %v387_v0, 2 }
 0x2c0   :  { %v389_v3 = vadd.f32 %v388_v1, %v387_v0 }
 0x2c2   :  { %v390_v5 = vrot.slane %v389_v3, 1 }
 0x2c4   :  { %v391_v7 = vadd.f32 %v390_v5, %v389_v3 }
 0x2c6   :  { %v402_v8 = vadd.f32 %v401_v6, %v391_v7 }
 0x2c8   :  { %v446_v9 = vmul.f32 -1.442695, %v402_v8 }
 0x2ca   :  { %511 = vpow2.f32 %v446_v9 }
 0x2d7   :  { %v512_v10 = vpop.eup %511 }
 0x2d8   :  { %v406_v11 = vadd.f32 1.0, %v512_v10 }
 0x2da   :  { %513 = vrcp.f32 %v406_v11 }
 0x2e7   :  { %v514_v12 = vpop.eup %513 }
 0x2e8   :  { %410 = vst.msk [vmem:[#allocation3] sm:$0x1] %vm409_vm13, %v514_v12 }
 0x2e9   :  { %526 = shalt.err (!%p523_p4)
}
 0x2ea   :  { %420 = dma.vmem_to_hbm [thread:$0]  %s418_s17, 16, %s667_s9, [#allocation4]  }
 0x2eb   :  { %535 = dma.done.wait [#allocation4], 16  }
 0x2ec   :  { %536 = vsyncadd [#allocation4], 4294967280 }
 0x2ed   :  { %424 = vsyncpa [#allocation4], 1 }

</bundles_post_ra>
